<compile_context>
chip_gen: v6e
topology: v6e:2x2x1
jax: 0.10.0
libtpu: 0.0.40
codegen_flags: <defaults>
</compile_context>

<pallas_src>
import functools

import jax
import jax.numpy as jnp
from jax import lax
from jax.experimental import pallas as pl
from jax.experimental.pallas import tpu as pltpu
from jax.scipy.linalg import block_diag


# ----------------------------------------------------------------------------
# Fused forward kernel (single program, one packed input slab, one output slab)
# ----------------------------------------------------------------------------
def _fused_forward_kernel(slab_ref, out_ref, *, layout, n_layers, nc, nt,
                          num_graphs, code_out_dims, output_size, final_size):
    f32 = jnp.float32
    n_total = nc + nt

    def get(name):
        r0, nrows, ncols = layout[name]          # static python ints
        return slab_ref[r0:r0 + nrows, 0:ncols]  # static, sublane-aligned slice

    def leaky_relu(x):
        return jnp.maximum(x, 0.2 * x)           # single VALU op (slope < 1)

    def elu(x):
        # exp argument clamped to <= 0 so the discarded branch never overflows.
        return jnp.where(x > 0.0, x, jnp.exp(jnp.minimum(x, 0.0)) - 1.0)

    def masked_softmax(logits, mask):
        # NOTE: every row must have >=1 True (self-loops / non-empty graphs).
        masked = jnp.where(mask, logits, f32(-1e9))
        m = jnp.max(masked, axis=-1, keepdims=True)
        p = jnp.where(mask, jnp.exp(masked - m), 0.0)
        denom = jnp.sum(p, axis=-1, keepdims=True)
        # divide routed to the otherwise-idle EUP
        return p * pl.reciprocal(denom, approx=True)

    def log_softmax(y):
        z = y - jnp.max(y, axis=-1, keepdims=True)
        return z - jnp.log(jnp.sum(jnp.exp(z), axis=-1, keepdims=True))

    # ---- merged block-diagonal GAT stack (code graph (+) transaction graph) --
    adj_mask = get("adj") > 0.0                  # [N, N] block-diagonal mask
    h = get("x")                                 # [N, Fin_c+Fin_t], block-clean
    for l in range(n_layers):
        w = get(f"w{l}")                         # block-diag [Fin_l, Fout_l]
        vec = get(f"vec{l}")                     # [3, Fout_l]: a_dst/a_src/bias
        hw = jnp.dot(h, w, preferred_element_type=f32)                   # [N,F]
        s_dst = lax.dot_general(hw, vec[0:1, :], (((1,), (1,)), ((), ())),
                                preferred_element_type=f32)              # [N,1]
        s_src = lax.dot_general(vec[1:2, :], hw, (((1,), (1,)), ((), ())),
                                preferred_element_type=f32)              # [1,N]
        alpha = masked_softmax(leaky_relu(s_dst + s_src), adj_mask)      # [N,N]
        out = jnp.dot(alpha, hw, preferred_element_type=f32) + vec[2:3, :]
        if l < n_layers - 1:
            # Zero the cross-block columns contaminated by the shared bias row
            # so block-cleanliness (hence attention-score correctness) is
            # preserved into the next layer; then the inter-layer ELU.
            f_out = w.shape[1]
            foc = code_out_dims[l]
            keep = (lax.broadcasted_iota(jnp.int32, (n_total, f_out), 0) < nc) == (
                lax.broadcasted_iota(jnp.int32, (n_total, f_out), 1) < foc)
            h = elu(jnp.where(keep, out, 0.0))
        else:
            h = out                              # off-block cols never read

    code_emb = h[0:nc, 0:code_out_dims[-1]]                          # [Nc,out]
    trans_h = h[nc:n_total,
                code_out_dims[-1]:code_out_dims[-1] + output_size]   # [Nt,out]

    # ---- GlobalAttention pooling over the transaction graph -----------------
    gate_blk = get("gate")                       # row0 = w_gate, row1[0]=b_gate
    gate = lax.dot_general(gate_blk[0:1, :], trans_h, (((1,), (1,)), ((), ())),
                           preferred_element_type=f32) + gate_blk[1:2, 0:1]
    alpha_pool = masked_softmax(gate, get("member") > 0.5)           # [B,Nt]
    trans_emb = jnp.dot(alpha_pool, trans_h, preferred_element_type=f32)

    # ---- mask row-selection of code_emb (one-hot gather on the MXU) ---------
    code_sel = jnp.dot(get("sel"), code_emb, preferred_element_type=f32)

    # ---- heads: linear_one + concat head via two lane-fused matmuls ---------
    head_b = get("head_b")                       # [1, 2*final]: [b_one | b_cat]
    b1 = head_b[0:1, 0:final_size]
    b2 = head_b[0:1, final_size:2 * final_size]
    code_part = jnp.dot(code_sel, get("head_c"), preferred_element_type=f32)
    trans_part = jnp.dot(trans_emb, get("head_t"), preferred_element_type=f32)

    out_ref[0:num_graphs, :] = log_softmax(code_part[:, 0:final_size] + b1)
    out_ref[num_graphs:2 * num_graphs, :] = log_softmax(
        trans_part[:, 0:final_size] + b1)
    out_ref[2 * num_graphs:3 * num_graphs, :] = log_softmax(
        code_part[:, final_size:2 * final_size]
        + trans_part[:, final_size:2 * final_size] + b2)


# ----------------------------------------------------------------------------
# Slab packing: row-stack 2-D blocks, sublane-aligned, lane-padded -> one DMA
# ----------------------------------------------------------------------------
def _pack_slab(blocks, lane_width, align=8):
    parts, layout, row = [], {}, 0
    for name, a in blocks:
        nrows, ncols = a.shape
        nrows_pad = -(-nrows // align) * align   # keep every slice 8-aligned
        parts.append(jnp.pad(a.astype(jnp.float32),
                             ((0, nrows_pad - nrows), (0, lane_width - ncols))))
        layout[name] = (row, nrows, ncols)
        row += nrows_pad
    return jnp.concatenate(parts, axis=0), layout


# ----------------------------------------------------------------------------
# Wrapper: build block-diagonal merged operands, pack, one pallas_call
# ----------------------------------------------------------------------------
@functools.partial(jax.jit, static_argnames=("num_graphs",))
def forward(params, trans_x, trans_adj, trans_batch, code_x, code_adj,
            mask_idx, *, num_graphs):
    """Fused forward pass: one packed-slab DMA, one pallas_call, one output slab.

    TODO(synk): the reference picks train/val/test mask by batch size
    (256/64/80); here the caller supplies the selected code-node indices.
    """
    code_gat, trans_gat = params["code_gat"], params["trans_gat"]
    if len(code_gat) != len(trans_gat):
        # TODO(synk): unequal stack depths need separate (non-merged) loops.
        raise NotImplementedError("block-diagonal merge needs equal layer counts")
    n_layers = len(code_gat)
    output_size, final_size = params["linear_one"]["w"].shape
    nc, nt = code_x.shape[0], trans_x.shape[0]

    # -- merged block-diagonal operands + everything else packed into one slab
    blocks = [("x", block_diag(code_x, trans_x)),
              ("adj", block_diag(code_adj, trans_adj))]
    code_out_dims = []
    for l, (cl, tl) in enumerate(zip(code_gat, trans_gat)):
        code_out_dims.append(cl["w"].shape[1])
        blocks.append((f"w{l}", block_diag(cl["w"], tl["w"])))
        blocks.append((f"vec{l}", jnp.concatenate([
            jnp.concatenate([cl["a_dst"].T, tl["a_dst"].T], axis=1),
            jnp.concatenate([cl["a_src"], tl["a_src"]], axis=1),
            jnp.concatenate([cl["b"], tl["b"]], axis=1)], axis=0)))
    blocks.append(("gate", jnp.concatenate(
        [params["gate"]["w"],
         jnp.pad(params["gate"]["b"], ((0, 0), (0, output_size - 1)))], axis=0)))
    member = (trans_batch.astype(jnp.int32)[None, :] ==
              jnp.arange(num_graphs, dtype=jnp.int32)[:, None]).astype(jnp.float32)
    sel = (mask_idx.astype(jnp.int32)[:, None] ==
           jnp.arange(nc, dtype=jnp.int32)[None, :]).astype(jnp.float32)
    blocks += [("member", member), ("sel", sel)]
    w1, b1 = params["linear_one"]["w"], params["linear_one"]["b"]
    wf, bf = params["linear"]["w"], params["linear"]["b"]
    blocks += [("head_c", jnp.concatenate([w1, wf[:output_size]], axis=1)),
               ("head_t", jnp.concatenate([w1, wf[output_size:]], axis=1)),
               ("head_b", jnp.concatenate([b1, bf], axis=1))]

    lane_width = -(-max(a.shape[1] for _, a in blocks) // 128) * 128
    slab, layout = _pack_slab(blocks, lane_width)

    # -- advisory cost estimate so XLA schedules around the custom call sensibly
    n_total = nc + nt
    flops, transc = 0, 0
    f_prev = code_x.shape[1] + trans_x.shape[1]
    for cl, tl in zip(code_gat, trans_gat):
        f_out = cl["w"].shape[1] + tl["w"].shape[1]
        flops += 2 * n_total * f_prev * f_out + 4 * n_total * f_out
        flops += 2 * n_total * n_total * f_out + 8 * n_total * n_total
        transc += n_total * n_total + n_total
        f_prev = f_out
    flops += 2 * nt * output_size + 2 * num_graphs * nt * output_size
    flops += 2 * num_graphs * nc * output_size
    flops += 2 * 2 * num_graphs * output_size * 2 * final_size
    transc += num_graphs * nt + 3 * num_graphs * final_size
    bytes_accessed = slab.size * 4 + 3 * num_graphs * final_size * 4

    kernel = functools.partial(
        _fused_forward_kernel, layout=layout, n_layers=n_layers, nc=nc, nt=nt,
        num_graphs=num_graphs, code_out_dims=tuple(code_out_dims),
        output_size=output_size, final_size=final_size)
    vmem = pl.BlockSpec(memory_space=pltpu.MemorySpace.VMEM)
    out = pl.pallas_call(
        kernel,
        out_shape=jax.ShapeDtypeStruct((3 * num_graphs, final_size), jnp.float32),
        in_specs=[vmem],
        out_specs=vmem,
        cost_estimate=pl.CostEstimate(flops=int(flops),
                                      transcendentals=int(transc),
                                      bytes_accessed=int(bytes_accessed)),
    )(slab)
    return (out[0:num_graphs], out[num_graphs:2 * num_graphs],
            out[2 * num_graphs:3 * num_graphs])


# ----------------------------------------------------------------------------
# Parameter construction (deterministic, synthetic)
# ----------------------------------------------------------------------------
def _gat_params(key, f_in, f_out):
    k1, k2, k3, k4 = jax.random.split(key, 4)
    s = 1.0 / jnp.sqrt(jnp.float32(f_in))
    return dict(
        w=jax.random.uniform(k1, (f_in, f_out), jnp.float32, -s, s),
        a_dst=jax.random.uniform(k2, (f_out, 1), jnp.float32, -s, s),
        a_src=jax.random.uniform(k3, (1, f_out), jnp.float32, -s, s),
        b=jax.random.uniform(k4, (1, f_out), jnp.float32, -s, s),
    )


def init_params(key, trans_input, trans_hidden, code_input, code_hidden,
                output_size, num_layers, final_size):
    keys = jax.random.split(key, num_layers + 8)
    # GlobalAttentionNet (transaction graph): num_layers convs + attention gate.
    # TODO(synk): GlobalAttentionNet's internal conv type is not given in the
    # spec; GATConv layers are assumed (consistent with the rest of the model).
    trans_dims = [trans_input] + [trans_hidden] * (num_layers - 1) + [output_size]
    trans_gat = [_gat_params(keys[i], trans_dims[i], trans_dims[i + 1])
                 for i in range(num_layers)]
    # GAT_Net_1 (code graph): 2 GAT convs.
    code_gat = [_gat_params(keys[num_layers], code_input, code_hidden),
                _gat_params(keys[num_layers + 1], code_hidden, output_size)]
    sg = 1.0 / jnp.sqrt(jnp.float32(output_size))
    gate = dict(
        w=jax.random.uniform(keys[num_layers + 2], (1, output_size),
                             jnp.float32, -sg, sg),
        b=jnp.zeros((1, 1), jnp.float32),
    )
    s1 = 1.0 / jnp.sqrt(jnp.float32(output_size))
    s2 = 1.0 / jnp.sqrt(jnp.float32(2 * output_size))
    linear_one = dict(
        w=jax.random.uniform(keys[-4], (output_size, final_size),
                             jnp.float32, -s1, s1),
        b=jax.random.uniform(keys[-3], (1, final_size), jnp.float32, -s1, s1),
    )
    linear = dict(
        w=jax.random.uniform(keys[-2], (2 * output_size, final_size),
                             jnp.float32, -s2, s2),
        b=jax.random.uniform(keys[-1], (1, final_size), jnp.float32, -s2, s2),
    )
    return dict(trans_gat=trans_gat, code_gat=code_gat, gate=gate,
                linear_one=linear_one, linear=linear)


# ----------------------------------------------------------------------------
# Pure-JAX reference (non-merged), for correctness checking of the fused kernel
# ----------------------------------------------------------------------------
def _reference_forward(params, trans_x, trans_adj, trans_batch, code_x,
                       code_adj, mask_idx, num_graphs):
    leaky = lambda x: jnp.where(x > 0, x, 0.2 * x)
    elu = lambda x: jnp.where(x > 0, x, jnp.exp(jnp.minimum(x, 0.0)) - 1.0)

    def gat(x, adj, layer, act):
        h = x @ layer["w"]
        e = leaky(h @ layer["a_dst"] + (h @ layer["a_src"].T).T)
        mask = adj > 0
        a = jax.nn.softmax(jnp.where(mask, e, -1e9), axis=-1)
        a = jnp.where(mask, a, 0.0)
        out = a @ h + layer["b"]
        return elu(out) if act else out

    h_c = code_x
    for i, l in enumerate(params["code_gat"]):
        h_c = gat(h_c, code_adj, l, i < len(params["code_gat"]) - 1)
    h_t = trans_x
    for i, l in enumerate(params["trans_gat"]):
        h_t = gat(h_t, trans_adj, l, i < len(params["trans_gat"]) - 1)
    gate = (h_t @ params["gate"]["w"].T + params["gate"]["b"])[:, 0]
    member = trans_batch[None, :] == jnp.arange(num_graphs)[:, None]
    alpha = jax.nn.softmax(jnp.where(member, gate[None, :], -1e9), axis=-1)
    trans_emb = alpha @ h_t
    code_sel = h_c[mask_idx]
    ls = lambda z: jax.nn.log_softmax(z, axis=-1)
    code_prob = ls(code_sel @ params["linear_one"]["w"] + params["linear_one"]["b"])
    trans_prob = ls(trans_emb @ params["linear_one"]["w"] + params["linear_one"]["b"])
    cat = jnp.concatenate([code_sel, trans_emb], axis=1)
    final_prob = ls(cat @ params["linear"]["w"] + params["linear"]["b"])
    return code_prob, trans_prob, final_prob


# ----------------------------------------------------------------------------
# Demo
# ----------------------------------------------------------------------------
if __name__ == "__main__":
    key = jax.random.PRNGKey(0)
    (k_params, k_tx, k_ta, k_cx, k_ca) = jax.random.split(key, 5)

    # sizes
    trans_input_size, trans_hidden = 8, 16
    code_input_size, code_hidden = 8, 16
    output_size, num_layers, final_size = 16, 2, 4
    num_graphs, nodes_per_graph = 2, 8
    n_trans = num_graphs * nodes_per_graph          # 16 transaction nodes
    n_code = 16                                     # 16 code nodes

    params = init_params(k_params, trans_input_size, trans_hidden,
                         code_input_size, code_hidden, output_size,
                         num_layers, final_size)

    # transaction graph batch: block-diagonal adjacency (+ self-loops)
    trans_x = jax.random.normal(k_tx, (n_trans, trans_input_size), jnp.float32)
    trans_batch = jnp.repeat(jnp.arange(num_graphs), nodes_per_graph)
    rand_adj = (jax.random.uniform(k_ta, (n_trans, n_trans)) < 0.3)
    same_graph = trans_batch[:, None] == trans_batch[None, :]
    trans_adj = jnp.maximum((rand_adj & same_graph).astype(jnp.float32),
                            jnp.eye(n_trans, dtype=jnp.float32))

    # code graph (+ self-loops)
    code_x = jax.random.normal(k_cx, (n_code, code_input_size), jnp.float32)
    code_adj = jnp.maximum(
        (jax.random.uniform(k_ca, (n_code, n_code)) < 0.3).astype(jnp.float32),
        jnp.eye(n_code, dtype=jnp.float32))

    # mask selects as many code nodes as there are graphs in the batch
    mask_idx = jnp.array([3, 10], dtype=jnp.int32)

    code_prob, trans_prob, final_prob = forward(
        params, trans_x, trans_adj, trans_batch, code_x, code_adj, mask_idx,
        num_graphs=num_graphs)
    jax.block_until_ready((code_prob, trans_prob, final_prob))

    assert code_prob.shape == (num_graphs, final_size)
    assert trans_prob.shape == (num_graphs, final_size)
    assert final_prob.shape == (num_graphs, final_size)
    # log_softmax rows must (approximately) normalize to 1 in prob space
    assert bool(jnp.all(jnp.abs(jnp.sum(jnp.exp(final_prob), axis=-1) - 1.0) < 1e-3))

    # correctness vs. pure-JAX reference (loose tol: approx reciprocal in-kernel)
    ref = _reference_forward(params, trans_x, trans_adj, trans_batch,
                             code_x, code_adj, mask_idx, num_graphs)
    for got, want in zip((code_prob, trans_prob, final_prob), ref):
        assert got.shape == want.shape
        assert bool(jnp.all(jnp.abs(got - want) < 5e-2))

    print("KERNEL_OK")
</pallas_src>

<mosaic_0001>
module attributes {stable_mosaic.version = 11 : i64} {
  func.func @_fused_forward_kernel(%arg0: memref<192x128xf32, #tpu.memory_space<vmem>>, %arg1: memref<6x4xf32, #tpu.memory_space<vmem>>) attributes {dimension_semantics = [], scalar_prefetch = 0 : i64, scratch_operands = 0 : i64, tpu.core_type = #tpu.core_type<tc>} {
    %c32 = arith.constant 32 : index
    %c0 = arith.constant 0 : index
    %0 = vector.load %arg0[%c32, %c0] : memref<192x128xf32, #tpu.memory_space<vmem>>, vector<32x32xf32>
    %cst = arith.constant 0.000000e+00 : f32
    %1 = vector.broadcast %cst : f32 to vector<32x32xf32>
    %2 = arith.cmpf ogt, %0, %1 : vector<32x32xf32>
    %c0_0 = arith.constant 0 : index
    %c0_1 = arith.constant 0 : index
    %3 = vector.load %arg0[%c0_0, %c0_1] : memref<192x128xf32, #tpu.memory_space<vmem>>, vector<32x16xf32>
    %c64 = arith.constant 64 : index
    %c0_2 = arith.constant 0 : index
    %4 = vector.load %arg0[%c64, %c0_2] : memref<192x128xf32, #tpu.memory_space<vmem>>, vector<16x32xf32>
    %c80 = arith.constant 80 : index
    %c0_3 = arith.constant 0 : index
    %5 = vector.load %arg0[%c80, %c0_3] : memref<192x128xf32, #tpu.memory_space<vmem>>, vector<3x32xf32>
    %cst_4 = arith.constant dense<0.000000e+00> : vector<32x32xf32>
    %6 = tpu.matmul %3, %4, %cst_4 {dimension_numbers = #tpu.dot_dimension_numbers<[1], [0], [0], [1], [0, 0, 1, 1], [], []>} : vector<32x16xf32>, vector<16x32xf32>, vector<32x32xf32> -> vector<32x32xf32>
    %7 = vector.extract_strided_slice %5 {offsets = [0, 0], sizes = [1, 32], strides = [1, 1]} : vector<3x32xf32> to vector<1x32xf32>
    %cst_5 = arith.constant dense<0.000000e+00> : vector<32x1xf32>
    %8 = tpu.matmul %6, %7, %cst_5 {dimension_numbers = #tpu.dot_dimension_numbers<[1], [1], [0], [0], [0, 0, 1, 0], [], []>} : vector<32x32xf32>, vector<1x32xf32>, vector<32x1xf32> -> vector<32x1xf32>
    %9 = vector.extract_strided_slice %5 {offsets = [1, 0], sizes = [1, 32], strides = [1, 1]} : vector<3x32xf32> to vector<1x32xf32>
    %cst_6 = arith.constant dense<0.000000e+00> : vector<1x32xf32>
    %10 = tpu.matmul %9, %6, %cst_6 {dimension_numbers = #tpu.dot_dimension_numbers<[1], [1], [0], [0], [0, 0, 1, 0], [], []>} : vector<1x32xf32>, vector<32x32xf32>, vector<1x32xf32> -> vector<1x32xf32>
    %11 = vector.broadcast %8 : vector<32x1xf32> to vector<32x32xf32>
    %12 = vector.broadcast %10 : vector<1x32xf32> to vector<32x32xf32>
    %13 = arith.addf %11, %12 : vector<32x32xf32>
    %cst_7 = arith.constant 2.000000e-01 : f32
    %14 = vector.broadcast %cst_7 : f32 to vector<32x32xf32>
    %15 = arith.mulf %14, %13 : vector<32x32xf32>
    %16 = arith.maximumf %13, %15 : vector<32x32xf32>
    %cst_8 = arith.constant -1.000000e+09 : f32
    %17 = vector.broadcast %cst_8 : f32 to vector<32x32xf32>
    %18 = arith.select %2, %16, %17 : vector<32x32xi1>, vector<32x32xf32>
    %cst_9 = arith.constant dense<0xFF800000> : vector<32xf32>
    %19 = vector.multi_reduction <maximumf>, %18, %cst_9 [1] : vector<32x32xf32> to vector<32xf32>
    %20 = vector.shape_cast %19 : vector<32xf32> to vector<32x1xf32>
    %21 = vector.broadcast %20 : vector<32x1xf32> to vector<32x32xf32>
    %22 = arith.subf %18, %21 : vector<32x32xf32>
    %23 = math.exp %22 : vector<32x32xf32>
    %cst_10 = arith.constant 0.000000e+00 : f32
    %24 = vector.broadcast %cst_10 : f32 to vector<32x32xf32>
    %25 = arith.select %2, %23, %24 : vector<32x32xi1>, vector<32x32xf32>
    %cst_11 = arith.constant dense<0.000000e+00> : vector<32xf32>
    %26 = vector.multi_reduction <add>, %25, %cst_11 [1] : vector<32x32xf32> to vector<32xf32>
    %27 = vector.shape_cast %26 : vector<32xf32> to vector<32x1xf32>
    %28 = tpu.reciprocal %27 {approx = true} : vector<32x1xf32> -> vector<32x1xf32>
    %29 = vector.broadcast %28 : vector<32x1xf32> to vector<32x32xf32>
    %30 = arith.mulf %25, %29 : vector<32x32xf32>
    %cst_12 = arith.constant dense<0.000000e+00> : vector<32x32xf32>
    %31 = tpu.matmul %30, %6, %cst_12 {dimension_numbers = #tpu.dot_dimension_numbers<[1], [0], [0], [1], [0, 0, 1, 1], [], []>} : vector<32x32xf32>, vector<32x32xf32>, vector<32x32xf32> -> vector<32x32xf32>
    %32 = vector.extract_strided_slice %5 {offsets = [2, 0], sizes = [1, 32], strides = [1, 1]} : vector<3x32xf32> to vector<1x32xf32>
    %33 = vector.broadcast %32 : vector<1x32xf32> to vector<32x32xf32>
    %34 = arith.addf %31, %33 : vector<32x32xf32>
    %35 = tpu.iota {dimensions = array<i32: 0>} : vector<32x32xi32>
    %c16_i32 = arith.constant 16 : i32
    %36 = vector.broadcast %c16_i32 : i32 to vector<32x32xi32>
    %37 = arith.cmpi slt, %35, %36 : vector<32x32xi32>
    %38 = tpu.iota {dimensions = array<i32: 1>} : vector<32x32xi32>
    %c16_i32_13 = arith.constant 16 : i32
    %39 = vector.broadcast %c16_i32_13 : i32 to vector<32x32xi32>
    %40 = arith.cmpi slt, %38, %39 : vector<32x32xi32>
    %41 = arith.xori %37, %40 : vector<32x32xi1>
    %cst_14 = arith.constant dense<true> : vector<32x32xi1>
    %42 = arith.xori %41, %cst_14 : vector<32x32xi1>
    %cst_15 = arith.constant 0.000000e+00 : f32
    %43 = vector.broadcast %cst_15 : f32 to vector<32x32xf32>
    %44 = arith.select %42, %34, %43 : vector<32x32xi1>, vector<32x32xf32>
    %cst_16 = arith.constant 0.000000e+00 : f32
    %45 = vector.broadcast %cst_16 : f32 to vector<32x32xf32>
    %46 = arith.cmpf ogt, %44, %45 : vector<32x32xf32>
    %cst_17 = arith.constant 0.000000e+00 : f32
    %47 = vector.broadcast %cst_17 : f32 to vector<32x32xf32>
    %48 = arith.minimumf %44, %47 : vector<32x32xf32>
    %49 = math.exp %48 : vector<32x32xf32>
    %cst_18 = arith.constant 1.000000e+00 : f32
    %50 = vector.broadcast %cst_18 : f32 to vector<32x32xf32>
    %51 = arith.subf %49, %50 : vector<32x32xf32>
    %52 = arith.select %46, %44, %51 : vector<32x32xi1>, vector<32x32xf32>
    %c88 = arith.constant 88 : index
    %c0_19 = arith.constant 0 : index
    %53 = vector.load %arg0[%c88, %c0_19] : memref<192x128xf32, #tpu.memory_space<vmem>>, vector<32x32xf32>
    %c120 = arith.constant 120 : index
    %c0_20 = arith.constant 0 : index
    %54 = vector.load %arg0[%c120, %c0_20] : memref<192x128xf32, #tpu.memory_space<vmem>>, vector<3x32xf32>
    %cst_21 = arith.constant dense<0.000000e+00> : vector<32x32xf32>
    %55 = tpu.matmul %52, %53, %cst_21 {dimension_numbers = #tpu.dot_dimension_numbers<[1], [0], [0], [1], [0, 0, 1, 1], [], []>} : vector<32x32xf32>, vector<32x32xf32>, vector<32x32xf32> -> vector<32x32xf32>
    %56 = vector.extract_strided_slice %54 {offsets = [0, 0], sizes = [1, 32], strides = [1, 1]} : vector<3x32xf32> to vector<1x32xf32>
    %cst_22 = arith.constant dense<0.000000e+00> : vector<32x1xf32>
    %57 = tpu.matmul %55, %56, %cst_22 {dimension_numbers = #tpu.dot_dimension_numbers<[1], [1], [0], [0], [0, 0, 1, 0], [], []>} : vector<32x32xf32>, vector<1x32xf32>, vector<32x1xf32> -> vector<32x1xf32>
    %58 = vector.extract_strided_slice %54 {offsets = [1, 0], sizes = [1, 32], strides = [1, 1]} : vector<3x32xf32> to vector<1x32xf32>
    %cst_23 = arith.constant dense<0.000000e+00> : vector<1x32xf32>
    %59 = tpu.matmul %58, %55, %cst_23 {dimension_numbers = #tpu.dot_dimension_numbers<[1], [1], [0], [0], [0, 0, 1, 0], [], []>} : vector<1x32xf32>, vector<32x32xf32>, vector<1x32xf32> -> vector<1x32xf32>
    %60 = vector.broadcast %57 : vector<32x1xf32> to vector<32x32xf32>
    %61 = vector.broadcast %59 : vector<1x32xf32> to vector<32x32xf32>
    %62 = arith.addf %60, %61 : vector<32x32xf32>
    %cst_24 = arith.constant 2.000000e-01 : f32
    %63 = vector.broadcast %cst_24 : f32 to vector<32x32xf32>
    %64 = arith.mulf %63, %62 : vector<32x32xf32>
    %65 = arith.maximumf %62, %64 : vector<32x32xf32>
    %cst_25 = arith.constant -1.000000e+09 : f32
    %66 = vector.broadcast %cst_25 : f32 to vector<32x32xf32>
    %67 = arith.select %2, %65, %66 : vector<32x32xi1>, vector<32x32xf32>
    %cst_26 = arith.constant dense<0xFF800000> : vector<32xf32>
    %68 = vector.multi_reduction <maximumf>, %67, %cst_26 [1] : vector<32x32xf32> to vector<32xf32>
    %69 = vector.shape_cast %68 : vector<32xf32> to vector<32x1xf32>
    %70 = vector.broadcast %69 : vector<32x1xf32> to vector<32x32xf32>
    %71 = arith.subf %67, %70 : vector<32x32xf32>
    %72 = math.exp %71 : vector<32x32xf32>
    %cst_27 = arith.constant 0.000000e+00 : f32
    %73 = vector.broadcast %cst_27 : f32 to vector<32x32xf32>
    %74 = arith.select %2, %72, %73 : vector<32x32xi1>, vector<32x32xf32>
    %cst_28 = arith.constant dense<0.000000e+00> : vector<32xf32>
    %75 = vector.multi_reduction <add>, %74, %cst_28 [1] : vector<32x32xf32> to vector<32xf32>
    %76 = vector.shape_cast %75 : vector<32xf32> to vector<32x1xf32>
    %77 = tpu.reciprocal %76 {approx = true} : vector<32x1xf32> -> vector<32x1xf32>
    %78 = vector.broadcast %77 : vector<32x1xf32> to vector<32x32xf32>
    %79 = arith.mulf %74, %78 : vector<32x32xf32>
    %cst_29 = arith.constant dense<0.000000e+00> : vector<32x32xf32>
    %80 = tpu.matmul %79, %55, %cst_29 {dimension_numbers = #tpu.dot_dimension_numbers<[1], [0], [0], [1], [0, 0, 1, 1], [], []>} : vector<32x32xf32>, vector<32x32xf32>, vector<32x32xf32> -> vector<32x32xf32>
    %81 = vector.extract_strided_slice %54 {offsets = [2, 0], sizes = [1, 32], strides = [1, 1]} : vector<3x32xf32> to vector<1x32xf32>
    %82 = vector.broadcast %81 : vector<1x32xf32> to vector<32x32xf32>
    %83 = arith.addf %80, %82 : vector<32x32xf32>
    %84 = vector.extract_strided_slice %83 {offsets = [0, 0], sizes = [16, 16], strides = [1, 1]} : vector<32x32xf32> to vector<16x16xf32>
    %85 = vector.extract_strided_slice %83 {offsets = [16, 16], sizes = [16, 16], strides = [1, 1]} : vector<32x32xf32> to vector<16x16xf32>
    %c128 = arith.constant 128 : index
    %c0_30 = arith.constant 0 : index
    %86 = vector.load %arg0[%c128, %c0_30] : memref<192x128xf32, #tpu.memory_space<vmem>>, vector<2x16xf32>
    %87 = vector.extract_strided_slice %86 {offsets = [0, 0], sizes = [1, 16], strides = [1, 1]} : vector<2x16xf32> to vector<1x16xf32>
    %cst_31 = arith.constant dense<0.000000e+00> : vector<1x16xf32>
    %88 = tpu.matmul %87, %85, %cst_31 {dimension_numbers = #tpu.dot_dimension_numbers<[1], [1], [0], [0], [0, 0, 1, 0], [], []>} : vector<1x16xf32>, vector<16x16xf32>, vector<1x16xf32> -> vector<1x16xf32>
    %89 = vector.extract_strided_slice %86 {offsets = [1, 0], sizes = [1, 1], strides = [1, 1]} : vector<2x16xf32> to vector<1x1xf32>
    %90 = vector.broadcast %89 : vector<1x1xf32> to vector<1x16xf32>
    %91 = arith.addf %88, %90 : vector<1x16xf32>
    %c136 = arith.constant 136 : index
    %c0_32 = arith.constant 0 : index
    %92 = vector.load %arg0[%c136, %c0_32] : memref<192x128xf32, #tpu.memory_space<vmem>>, vector<2x16xf32>
    %cst_33 = arith.constant 5.000000e-01 : f32
    %93 = vector.broadcast %cst_33 : f32 to vector<2x16xf32>
    %94 = arith.cmpf ogt, %92, %93 : vector<2x16xf32>
    %cst_34 = arith.constant -1.000000e+09 : f32
    %95 = vector.shape_cast %91 : vector<1x16xf32> to vector<1x16xf32>
    %96 = vector.broadcast %95 : vector<1x16xf32> to vector<2x16xf32>
    %97 = vector.broadcast %cst_34 : f32 to vector<2x16xf32>
    %98 = arith.select %94, %96, %97 : vector<2x16xi1>, vector<2x16xf32>
    %cst_35 = arith.constant dense<0xFF800000> : vector<2xf32>
    %99 = vector.multi_reduction <maximumf>, %98, %cst_35 [1] : vector<2x16xf32> to vector<2xf32>
    %100 = vector.shape_cast %99 : vector<2xf32> to vector<2x1xf32>
    %101 = vector.broadcast %100 : vector<2x1xf32> to vector<2x16xf32>
    %102 = arith.subf %98, %101 : vector<2x16xf32>
    %103 = math.exp %102 : vector<2x16xf32>
    %cst_36 = arith.constant 0.000000e+00 : f32
    %104 = vector.broadcast %cst_36 : f32 to vector<2x16xf32>
    %105 = arith.select %94, %103, %104 : vector<2x16xi1>, vector<2x16xf32>
    %cst_37 = arith.constant dense<0.000000e+00> : vector<2xf32>
    %106 = vector.multi_reduction <add>, %105, %cst_37 [1] : vector<2x16xf32> to vector<2xf32>
    %107 = vector.shape_cast %106 : vector<2xf32> to vector<2x1xf32>
    %108 = tpu.reciprocal %107 {approx = true} : vector<2x1xf32> -> vector<2x1xf32>
    %109 = vector.broadcast %108 : vector<2x1xf32> to vector<2x16xf32>
    %110 = arith.mulf %105, %109 : vector<2x16xf32>
    %cst_38 = arith.constant dense<0.000000e+00> : vector<2x16xf32>
    %111 = tpu.matmul %110, %85, %cst_38 {dimension_numbers = #tpu.dot_dimension_numbers<[1], [0], [0], [1], [0, 0, 1, 1], [], []>} : vector<2x16xf32>, vector<16x16xf32>, vector<2x16xf32> -> vector<2x16xf32>
    %c144 = arith.constant 144 : index
    %c0_39 = arith.constant 0 : index
    %112 = vector.load %arg0[%c144, %c0_39] : memref<192x128xf32, #tpu.memory_space<vmem>>, vector<2x16xf32>
    %cst_40 = arith.constant dense<0.000000e+00> : vector<2x16xf32>
    %113 = tpu.matmul %112, %84, %cst_40 {dimension_numbers = #tpu.dot_dimension_numbers<[1], [0], [0], [1], [0, 0, 1, 1], [], []>} : vector<2x16xf32>, vector<16x16xf32>, vector<2x16xf32> -> vector<2x16xf32>
    %c184 = arith.constant 184 : index
    %c0_41 = arith.constant 0 : index
    %114 = vector.load %arg0[%c184, %c0_41] : memref<192x128xf32, #tpu.memory_space<vmem>>, vector<1x8xf32>
    %115 = vector.extract_strided_slice %114 {offsets = [0, 0], sizes = [1, 4], strides = [1, 1]} : vector<1x8xf32> to vector<1x4xf32>
    %116 = vector.extract_strided_slice %114 {offsets = [0, 4], sizes = [1, 4], strides = [1, 1]} : vector<1x8xf32> to vector<1x4xf32>
    %c152 = arith.constant 152 : index
    %c0_42 = arith.constant 0 : index
    %117 = vector.load %arg0[%c152, %c0_42] : memref<192x128xf32, #tpu.memory_space<vmem>>, vector<16x8xf32>
    %cst_43 = arith.constant dense<0.000000e+00> : vector<2x8xf32>
    %118 = tpu.matmul %113, %117, %cst_43 {dimension_numbers = #tpu.dot_dimension_numbers<[1], [0], [0], [1], [0, 0, 1, 1], [], []>} : vector<2x16xf32>, vector<16x8xf32>, vector<2x8xf32> -> vector<2x8xf32>
    %c168 = arith.constant 168 : index
    %c0_44 = arith.constant 0 : index
    %119 = vector.load %arg0[%c168, %c0_44] : memref<192x128xf32, #tpu.memory_space<vmem>>, vector<16x8xf32>
    %cst_45 = arith.constant dense<0.000000e+00> : vector<2x8xf32>
    %120 = tpu.matmul %111, %119, %cst_45 {dimension_numbers = #tpu.dot_dimension_numbers<[1], [0], [0], [1], [0, 0, 1, 1], [], []>} : vector<2x16xf32>, vector<16x8xf32>, vector<2x8xf32> -> vector<2x8xf32>
    %121 = vector.extract_strided_slice %118 {offsets = [0, 0], sizes = [2, 4], strides = [1, 1]} : vector<2x8xf32> to vector<2x4xf32>
    %122 = vector.broadcast %115 : vector<1x4xf32> to vector<2x4xf32>
    %123 = arith.addf %121, %122 : vector<2x4xf32>
    %cst_46 = arith.constant dense<0xFF800000> : vector<2xf32>
    %124 = vector.multi_reduction <maximumf>, %123, %cst_46 [1] : vector<2x4xf32> to vector<2xf32>
    %125 = vector.shape_cast %124 : vector<2xf32> to vector<2x1xf32>
    %126 = vector.broadcast %125 : vector<2x1xf32> to vector<2x4xf32>
    %127 = arith.subf %123, %126 : vector<2x4xf32>
    %128 = math.exp %127 : vector<2x4xf32>
    %cst_47 = arith.constant dense<0.000000e+00> : vector<2xf32>
    %129 = vector.multi_reduction <add>, %128, %cst_47 [1] : vector<2x4xf32> to vector<2xf32>
    %130 = vector.shape_cast %129 : vector<2xf32> to vector<2x1xf32>
    %131 = math.log %130 : vector<2x1xf32>
    %132 = vector.broadcast %131 : vector<2x1xf32> to vector<2x4xf32>
    %133 = arith.subf %127, %132 : vector<2x4xf32>
    %c0_48 = arith.constant 0 : index
    %c0_49 = arith.constant 0 : index
    %134 = vector.load %arg1[%c0_48, %c0_49] : memref<6x4xf32, #tpu.memory_space<vmem>>, vector<2x4xf32>
    tpu.vector_store %arg1[%c0_48, %c0_49], %133 {strides = array<i32>} : memref<6x4xf32, #tpu.memory_space<vmem>>, vector<2x4xf32>,
    %135 = vector.extract_strided_slice %120 {offsets = [0, 0], sizes = [2, 4], strides = [1, 1]} : vector<2x8xf32> to vector<2x4xf32>
    %136 = vector.broadcast %115 : vector<1x4xf32> to vector<2x4xf32>
    %137 = arith.addf %135, %136 : vector<2x4xf32>
    %cst_50 = arith.constant dense<0xFF800000> : vector<2xf32>
    %138 = vector.multi_reduction <maximumf>, %137, %cst_50 [1] : vector<2x4xf32> to vector<2xf32>
    %139 = vector.shape_cast %138 : vector<2xf32> to vector<2x1xf32>
    %140 = vector.broadcast %139 : vector<2x1xf32> to vector<2x4xf32>
    %141 = arith.subf %137, %140 : vector<2x4xf32>
    %142 = math.exp %141 : vector<2x4xf32>
    %cst_51 = arith.constant dense<0.000000e+00> : vector<2xf32>
    %143 = vector.multi_reduction <add>, %142, %cst_51 [1] : vector<2x4xf32> to vector<2xf32>
    %144 = vector.shape_cast %143 : vector<2xf32> to vector<2x1xf32>
    %145 = math.log %144 : vector<2x1xf32>
    %146 = vector.broadcast %145 : vector<2x1xf32> to vector<2x4xf32>
    %147 = arith.subf %141, %146 : vector<2x4xf32>
    %c2 = arith.constant 2 : index
    %c0_52 = arith.constant 0 : index
    %148 = vector.load %arg1[%c2, %c0_52] : memref<6x4xf32, #tpu.memory_space<vmem>>, vector<2x4xf32>
    tpu.vector_store %arg1[%c2, %c0_52], %147 {strides = array<i32>} : memref<6x4xf32, #tpu.memory_space<vmem>>, vector<2x4xf32>,
    %149 = vector.extract_strided_slice %118 {offsets = [0, 4], sizes = [2, 4], strides = [1, 1]} : vector<2x8xf32> to vector<2x4xf32>
    %150 = vector.extract_strided_slice %120 {offsets = [0, 4], sizes = [2, 4], strides = [1, 1]} : vector<2x8xf32> to vector<2x4xf32>
    %151 = arith.addf %149, %150 : vector<2x4xf32>
    %152 = vector.broadcast %116 : vector<1x4xf32> to vector<2x4xf32>
    %153 = arith.addf %151, %152 : vector<2x4xf32>
    %cst_53 = arith.constant dense<0xFF800000> : vector<2xf32>
    %154 = vector.multi_reduction <maximumf>, %153, %cst_53 [1] : vector<2x4xf32> to vector<2xf32>
    %155 = vector.shape_cast %154 : vector<2xf32> to vector<2x1xf32>
    %156 = vector.broadcast %155 : vector<2x1xf32> to vector<2x4xf32>
    %157 = arith.subf %153, %156 : vector<2x4xf32>
    %158 = math.exp %157 : vector<2x4xf32>
    %cst_54 = arith.constant dense<0.000000e+00> : vector<2xf32>
    %159 = vector.multi_reduction <add>, %158, %cst_54 [1] : vector<2x4xf32> to vector<2xf32>
    %160 = vector.shape_cast %159 : vector<2xf32> to vector<2x1xf32>
    %161 = math.log %160 : vector<2x1xf32>
    %162 = vector.broadcast %161 : vector<2x1xf32> to vector<2x4xf32>
    %163 = arith.subf %157, %162 : vector<2x4xf32>
    %c4 = arith.constant 4 : index
    %c0_55 = arith.constant 0 : index
    %164 = vector.load %arg1[%c4, %c0_55] : memref<6x4xf32, #tpu.memory_space<vmem>>, vector<2x4xf32>
    tpu.vector_store %arg1[%c4, %c0_55], %163 {strides = array<i32>} : memref<6x4xf32, #tpu.memory_space<vmem>>, vector<2x4xf32>,
    return
  }
}

</mosaic_0001>

<bundles_post_ra>
// kernel: forward.1
= control target key start
LH: loop header
LB: loop body
LE: loop exit
PB: predicated region body
PF: predicated region fallthrough
CT: control target
= control target key end

     0   :  { %vm23_vm0 = vcmask 130048   ;;  %v1558_v6 = vmov 0.0   ;;  %vm1559_vm1 = vmmov 0   ;;  %v121_v7 = vlaneseq  ;;  %s1562_s9 = smov 112   ;;  %s1823_s0 = inlined_call_operand.vmem [shape: f32[192,128], index: 0, kind: input, shape index: {}]   ;;  %s1824_s1 = inlined_call_operand.vmem [shape: f32[6,4], index: 1, kind: output, shape index: {}]  }
   0x1   :  { %v21_v0 = vld [vmem:[%s1823_s0 + $0x48] sm:$0xff]  ;;  %v20_v1 = vld [vmem:[%s1823_s0 + $0x40] sm:$0xff]  ;;  %v18_v4 = vld [vmem:[%s1823_s0 + $0x10] sm:$0xff]  ;;  %1395 = vmatprep.subr.mxu1 %v1558_v6  ;;  %1403 = vmatprep.mubr.msk.f32.mxu1 %vm1559_vm1, %v1558_v6  ;;  %vm129_vm2 = vcmask 261120   ;;  %vm1560_vm8 = vmmov 1  }
   0x2   :  { %v16_v2 = vld [vmem:[%s1823_s0] sm:$0xff]  ;;  %1385 = vmatprep.subr.mxu0 %v21_v0  ;;  %v17_v3 = vld [vmem:[%s1823_s0 + $0x8] sm:$0xff]  ;;  %v19_v5 = vld [vmem:[%s1823_s0 + $0x18] sm:$0xff]  ;;  %v1600_v8 = vshrl.u32 %v121_v7, 7 }
   0x3   :  { %1389 = vmatprep.mubr.msk.f32.mxu0 %vm23_vm0, %v16_v2  ;;  %1386 = vmatpush3.msra.mxu0 %v21_v0  ;;  %v1608_v10 = vld [vmem:[%s1823_s0 + $0x50] sm:$0x7]  ;;  %v1632_v32 = vld [vmem:[%s1823_s0 + $0x28] sm:$0xff]  ;;  %v1637_v34 = vld [vmem:[%s1823_s0 + $0x20] sm:$0xff] }
   0x4   :  { %1387 = vmatprep.subr.mxu0 %v20_v1  ;;  %v1603_v9 = vsub.s32 0, %v1600_v8  ;;  %v143_v24 = vrot.slane %v1608_v10, 1  ;;  %v1642_v38 = vld [vmem:[%s1823_s0 + $0x38] sm:$0xff]  ;;  %v1647_v39 = vld [vmem:[%s1823_s0 + $0x30] sm:$0xff]  ;;  %vm13_vm3 = vcmp.gt.f32.partialorder %v1632_v32, 0.0  ;;  %vm12_vm4 = vcmp.gt.f32.partialorder %v1637_v34, 0.0 }
   0x5   :  { %1388 = vmatpush3.msra.mxu0 %v20_v1  ;;  %vm15_vm5 = vcmp.gt.f32.partialorder %v1642_v38, 0.0  ;;  %vm14_vm6 = vcmp.gt.f32.partialorder %v1647_v39, 0.0 }
   0x6   :  { %1390 = vmatmul.mubr.msk.f32.vlgmr.msra.gmra.mxu0 %vm23_vm0, %v17_v3  ;;  %v124_v12 = vrot.slane %v1608_v10, %v1603_v9 }
   0x7   :  { %1392 = vmatprep.mubr.msk.f32.mxu0 %vm23_vm0, %v18_v4 }
   0xa   :  { %1393 = vmatmul.mubr.msk.f32.gmra.mxu0 %vm23_vm0, %v19_v5 }
  0xc6   :  { %v1391_v11 = vpop.f32.mrf.mxu0 }
  0xc7   :  { %v126_v17 = vmul.f32 %v1391_v11, %v124_v12 }
  0xc8   :  { %v102_v13 = vpop.f32.mrf.mxu0 }
  0xc9   :  { %v125_v14 = vmul.f32 %v124_v12, %v102_v13  ;;  %v133_v20 = vsel %vm129_vm2, %v126_v17, 0.0 }
  0xca   :  { %v1394_v15 = vpop.f32.mrf.mxu0 }
  0xcb   :  { %1396 = vmatpush3.xpose.msk.msra.mxu1 %vm129_vm2, %v1394_v15  ;;  %1406 = vmatprep.subr.mxu0 %v1394_v15  ;;  %v130_v16 = vsel %vm129_vm2, %v125_v14, 0.0  ;;  %v128_v22 = vmul.f32 %v1394_v15, %v124_v12 }
  0xcc   :  { %131 = vadd.xlane.f32.xlu0 %v130_v16  ;;  %v112_v18 = vpop.f32.mrf.mxu0  ;;  %1407 = vmatpush3.msra.mxu0 %v1394_v15 }
  0xcd   :  { %1408 = vmatprep.subr.mxu0 %v112_v18  ;;  %1397 = vmatprep.subr.mxu1 %v1558_v6  ;;  %v127_v19 = vmul.f32 %v124_v12, %v112_v18  ;;  %v139_v23 = vsel %vm129_vm2, %v128_v22, 0.0 }
  0xce   :  { %1409 = vmatpush3.msra.mxu0 %v112_v18 }
  0xcf   :  { %1398 = vmatpush3.xpose.msk.msra.mxu1 %vm129_vm2, %v112_v18  ;;  %1410 = vmatprep.subr.mxu0 %v1391_v11  ;;  %v136_v21 = vsel %vm129_vm2, %v127_v19, 0.0 }
  0xd0   :  { %134 = vadd.xlane.f32.xlu0 %v133_v20  ;;  %1411 = vmatpush3.msra.mxu0 %v1391_v11 }
  0xd1   :  { %137 = vadd.xlane.f32.xlu1 %v136_v21  ;;  %1412 = vmatprep.subr.mxu0 %v102_v13 }
  0xd2   :  { %1399 = vmatprep.subr.mxu1 %v1558_v6  ;;  %1413 = vmatpush3.msra.mxu0 %v102_v13 }
  0xd3   :  { %1400 = vmatpush3.xpose.msk.msra.mxu1 %vm129_vm2, %v1391_v11 }
  0xd4   :  { %1401 = vmatprep.subr.mxu1 %v1558_v6 }
  0xd5   :  { %140 = vadd.xlane.f32.xlu1 %v139_v23 }
  0xd7   :  { %1402 = vmatpush3.xpose.msk.msra.mxu1 %vm129_vm2, %v102_v13 }
  0xd8   :  { %1434 = vmatprep.subr.mxu1 %v1558_v6 }
  0xda   :  { %1404 = vmatmul.mubr.msk.f32.vlgmr.msra.gmra.mxu1 %vm129_vm2, %v143_v24 }
  0xdb   :  { %1442 = vmatprep.mubr.msk.f32.mxu1 %vm1559_vm1, %v1558_v6 }
 0x155   :  { %v132_v25 = vpop.xlane.xlu0 %131 }
 0x159   :  { %v135_v28 = vpop.xlane.xlu0 %134 }
 0x15a   :  { %v138_v26 = vpop.xlane.xlu1 %137 }
 0x15e   :  { %v141_v30 = vpop.xlane.xlu1 %140 }
 0x19a   :  { %v224_v27 = vpop.f32.mrf.mxu1 }
 0x19b   :  { %v231_v29 = vrot.slane %v224_v27, %v1603_v9 }
 0x19c   :  { %v1405_v31 = vpop.f32.mrf.mxu1 }
 0x19d   :  { %v233_v33 = vadd.f32 %v231_v29, %v135_v28  ;;  %v232_v35 = vadd.f32 %v231_v29, %v132_v25  ;;  %v235_v36 = vadd.f32 %v231_v29, %v141_v30  ;;  %v234_v37 = vadd.f32 %v231_v29, %v138_v26 }
 0x19f   :  { %v237_v40 = vmul.f32 0.2, %v233_v33  ;;  %v236_v41 = vmul.f32 0.2, %v232_v35  ;;  %v239_v42 = vmul.f32 0.2, %v235_v36 }
 0x1a0   :  { %v238_v43 = vmul.f32 0.2, %v234_v37 }
 0x1a1   :  { %v241_v44 = vmax.f32 %v233_v33, %v237_v40  ;;  %v240_v45 = vmax.f32 %v232_v35, %v236_v41  ;;  %v243_v46 = vmax.f32 %v235_v36, %v239_v42  ;;  %v448_v35 = vld [vmem:[%s1823_s0 + $0x70] sm:$0xff]  ;;  %v447_v36 = vld [vmem:[%s1823_s0 + $0x68] sm:$0xff]  ;;  %v445_v40 = vld [vmem:[%s1823_s0 + $0x58] sm:$0xff]  ;;  %v407_v41 = vand.u32 127, %v121_v7 }
 0x1a2   :  { %v242_v47 = vmax.f32 %v234_v37, %v238_v43  ;;  %1420 = vmatprep.subr.mxu0 %v448_v35  ;;  %v446_v37 = vld [vmem:[%s1823_s0 + $0x60] sm:$0xff]  ;;  %v298_v42 = vsub.s32 2, %v1600_v8 }
 0x1a3   :  { %v245_v48 = vsel %vm13_vm3, %v241_v44, -1e+09  ;;  %v244_v49 = vsel %vm12_vm4, %v240_v45, -1e+09  ;;  %v247_v52 = vsel %vm15_vm5, %v243_v46, -1e+09 }
 0x1a4   :  { %v251_v50 = vsel %vm129_vm2, %v245_v48, -inf  ;;  %v248_v51 = vsel %vm129_vm2, %v244_v49, -inf  ;;  %v246_v53 = vsel %vm14_vm6, %v242_v47, -1e+09  ;;  %v257_v54 = vsel %vm129_vm2, %v247_v52, -inf }
 0x1a5   :  { %252 = vmax.xlane.f32.xlu1 %v251_v50  ;;  %249 = vmax.xlane.f32.xlu0 %v248_v51  ;;  %v254_v55 = vsel %vm129_vm2, %v246_v53, -inf  ;;  %vm408_vm7 = vcmp.lt.s32.totalorder %v407_v41, 16  ;;  %v299_v43 = vrot.slane %v1608_v10, %v298_v42  ;;  %v822_v8 = vld [vmem:[%s1823_s0 + $0x80] sm:$0x3] }
 0x1a6   :  { %vm409_vm9 = vmxor %vm1560_vm8, %vm408_vm7 }
 0x1a7   :  { %vm413_vm10 = vmxor %vm409_vm9, %vm1560_vm8 }
 0x1a8   :  { %vm415_vm11 = vmxor %vm408_vm7, %vm1560_vm8 }
 0x1a9   :  { %258 = vmax.xlane.f32.xlu1 %v257_v54  ;;  %255 = vmax.xlane.f32.xlu0 %v254_v55 }
 0x22e   :  { %v253_v56 = vpop.xlane.xlu1 %252  ;;  %v250_v57 = vpop.xlane.xlu0 %249 }
 0x22f   :  { %v261_v58 = vsub.f32 %v245_v48, %v253_v56  ;;  %v260_v59 = vsub.f32 %v244_v49, %v250_v57 }
 0x231   :  { %v266_v60 = vmul.f32 1.442695, %v261_v58  ;;  %v264_v61 = vmul.f32 1.442695, %v260_v59 }
 0x232   :  { %v259_v62 = vpop.xlane.xlu1 %258  ;;  %v256_v63 = vpop.xlane.xlu0 %255 }
 0x233   :  { %1502 = vpow2.f32 %v266_v60  ;;  %v263_v0 = vsub.f32 %v247_v52, %v259_v62  ;;  %v262_v1 = vsub.f32 %v246_v53, %v256_v63 }
 0x234   :  { %1504 = vpow2.f32 %v264_v61 }
 0x235   :  { %v270_v2 = vmul.f32 1.442695, %v263_v0  ;;  %v268_v3 = vmul.f32 1.442695, %v262_v1 }
 0x237   :  { %1506 = vpow2.f32 %v270_v2 }
 0x238   :  { %1508 = vpow2.f32 %v268_v3 }
 0x240   :  { %v1503_v4 = vpop.eup %1502 }
 0x241   :  { %v1505_v5 = vpop.eup %1504  ;;  %v273_v11 = vsel %vm13_vm3, %v1503_v4, 0.0 }
 0x242   :  { %v279_v12 = vsel %vm129_vm2, %v273_v11, 0.0  ;;  %v272_v13 = vsel %vm12_vm4, %v1505_v5, 0.0 }
 0x243   :  { %280 = vadd.xlane.f32.xlu1 %v279_v12  ;;  %v276_v14 = vsel %vm129_vm2, %v272_v13, 0.0 }
 0x244   :  { %v1507_v15 = vpop.eup %1506  ;;  %277 = vadd.xlane.f32.xlu0 %v276_v14 }
 0x245   :  { %v1509_v16 = vpop.eup %1508  ;;  %v275_v17 = vsel %vm15_vm5, %v1507_v15, 0.0  ;;  %v1705_v15 = vld [vmem:[%s1823_s0 + $0x78] sm:$0x7] }
 0x246   :  { %v285_v18 = vsel %vm129_vm2, %v275_v17, 0.0  ;;  %v274_v19 = vsel %vm14_vm6, %v1509_v16, 0.0  ;;  %v550_v16 = vrot.slane %v1705_v15, %v1603_v9 }
 0x247   :  { %286 = vadd.xlane.f32.xlu1 %v285_v18  ;;  %v282_v20 = vsel %vm129_vm2, %v274_v19, 0.0 }
 0x248   :  { %283 = vadd.xlane.f32.xlu0 %v282_v20 }
 0x2cc   :  { %v281_v21 = vpop.xlane.xlu1 %280 }
 0x2cd   :  { %1510 = vrcp.f32 %v281_v21  ;;  %v278_v22 = vpop.xlane.xlu0 %277 }
 0x2ce   :  { %1512 = vrcp.f32 %v278_v22 }
 0x2d0   :  { %v287_v23 = vpop.xlane.xlu1 %286 }
 0x2d1   :  { %1514 = vrcp.f32 %v287_v23  ;;  %v284_v24 = vpop.xlane.xlu0 %283 }
 0x2d2   :  { %1516 = vrcp.f32 %v284_v24 }
 0x2da   :  { %v1511_v25 = vpop.eup %1510 }
 0x2db   :  { %v1513_v26 = vpop.eup %1512  ;;  %v293_v27 = vmul.f32 %v1511_v25, %v273_v11 }
 0x2dc   :  { %v292_v28 = vmul.f32 %v1513_v26, %v272_v13 }
 0x2de   :  { %v1515_v29 = vpop.eup %1514  ;;  %1414 = vmatprep.mubr.msk.f32.mxu0 %vm129_vm2, %v292_v28 }
 0x2df   :  { %v1517_v30 = vpop.eup %1516  ;;  %1415 = vmatmul.mubr.msk.f32.vlgmr.msra.gmra.mxu0 %vm129_vm2, %v293_v27  ;;  %v295_v31 = vmul.f32 %v1515_v29, %v275_v17  ;;  %v568_v29 = vrot.slane %v1705_v15, 1 }
 0x2e0   :  { %v294_v33 = vmul.f32 %v1517_v30, %v274_v19  ;;  %1421 = vmatpush3.msra.mxu0 %v448_v35 }
 0x2e1   :  { %1422 = vmatprep.subr.mxu0 %v447_v36 }
 0x2e2   :  { %1417 = vmatprep.mubr.msk.f32.mxu0 %vm129_vm2, %v294_v33  ;;  %1423 = vmatpush3.msra.mxu0 %v447_v36 }
 0x2e3   :  { %1418 = vmatmul.mubr.msk.f32.gmra.mxu0 %vm129_vm2, %v295_v31  ;;  %1424 = vmatprep.subr.mxu0 %v446_v37 }
 0x2e4   :  { %1425 = vmatpush3.msra.mxu0 %v446_v37 }
 0x2e5   :  { %1426 = vmatprep.subr.mxu0 %v445_v40 }
 0x2e6   :  { %1427 = vmatpush3.msra.mxu0 %v445_v40 }
 0x39f   :  { %v1416_v44 = vpop.f32.mrf.mxu0 }
 0x3a0   :  { %v384_v45 = vadd.f32 %v1416_v44, %v299_v43 }
 0x3a1   :  { %v378_v46 = vpop.f32.mrf.mxu0 }
 0x3a2   :  { %v418_v47 = vsel %vm413_vm10, %v384_v45, 0.0  ;;  %v379_v48 = vadd.f32 %v378_v46, %v299_v43 }
 0x3a3   :  { %v426_v49 = vmin.f32 %v418_v47, 0.0  ;;  %v1419_v50 = vpop.f32.mrf.mxu0  ;;  %vm422_vm13 = vcmp.gt.f32.partialorder %v418_v47, 0.0 }
 0x3a4   :  { %v417_v51 = vsel %vm413_vm10, %v379_v48, 0.0  ;;  %v394_v7 = vadd.f32 %v1419_v50, %v299_v43 }
 0x3a5   :  { %v431_v52 = vmul.f32 1.442695, %v426_v49  ;;  %v425_v53 = vmin.f32 %v417_v51, 0.0  ;;  %v388_v54 = vpop.f32.mrf.mxu0  ;;  %vm421_vm12 = vcmp.gt.f32.partialorder %v417_v51, 0.0 }
 0x3a6   :  { %v420_v55 = vsel %vm415_vm11, %v394_v7, 0.0  ;;  %v389_v56 = vadd.f32 %v388_v54, %v299_v43 }
 0x3a7   :  { %1518 = vpow2.f32 %v431_v52  ;;  %v429_v10 = vmul.f32 1.442695, %v425_v53  ;;  %v428_v57 = vmin.f32 %v420_v55, 0.0  ;;  %vm424_vm15 = vcmp.gt.f32.partialorder %v420_v55, 0.0 }
 0x3a8   :  { %v419_v58 = vsel %vm415_vm11, %v389_v56, 0.0 }
 0x3a9   :  { %1520 = vpow2.f32 %v429_v10  ;;  %v435_v59 = vmul.f32 1.442695, %v428_v57  ;;  %v427_v60 = vmin.f32 %v419_v58, 0.0  ;;  %vm423_vm14 = vcmp.gt.f32.partialorder %v419_v58, 0.0 }
 0x3ab   :  { %1522 = vpow2.f32 %v435_v59  ;;  %v433_v61 = vmul.f32 1.442695, %v427_v60 }
 0x3ad   :  { %1524 = vpow2.f32 %v433_v61 }
 0x3b4   :  { %v1519_v62 = vpop.eup %1518 }
 0x3b5   :  { %v1306_v0 = vadd.f32 -1.0, %v1519_v62 }
 0x3b6   :  { %v1521_v63 = vpop.eup %1520 }
 0x3b7   :  { %v1305_v1 = vadd.f32 -1.0, %v1521_v63  ;;  %v442_v5 = vsel %vm422_vm13, %v418_v47, %v1306_v0 }
 0x3b8   :  { %v1523_v2 = vpop.eup %1522 }
 0x3b9   :  { %v441_v3 = vsel %vm421_vm12, %v417_v51, %v1305_v1  ;;  %v1308_v11 = vadd.f32 -1.0, %v1523_v2 }
 0x3ba   :  { %v1525_v4 = vpop.eup %1524  ;;  %1428 = vmatprep.mubr.msk.f32.mxu0 %vm129_vm2, %v441_v3 }
 0x3bb   :  { %1429 = vmatmul.mubr.msk.f32.vlgmr.msra.gmra.mxu0 %vm129_vm2, %v442_v5  ;;  %v1307_v12 = vadd.f32 -1.0, %v1525_v4  ;;  %v444_v14 = vsel %vm424_vm15, %v420_v55, %v1308_v11 }
 0x3bd   :  { %v443_v13 = vsel %vm423_vm14, %v419_v58, %v1307_v12 }
 0x3be   :  { %1431 = vmatprep.mubr.msk.f32.mxu0 %vm129_vm2, %v443_v13 }
 0x3bf   :  { %1432 = vmatmul.mubr.msk.f32.gmra.mxu0 %vm129_vm2, %v444_v14 }
 0x47b   :  { %v1430_v17 = vpop.f32.mrf.mxu0 }
 0x47c   :  { %v552_v18 = vmul.f32 %v1430_v17, %v550_v16 }
 0x47d   :  { %v528_v19 = vpop.f32.mrf.mxu0 }
 0x47e   :  { %v558_v20 = vsel %vm129_vm2, %v552_v18, 0.0  ;;  %v551_v21 = vmul.f32 %v550_v16, %v528_v19 }
 0x47f   :  { %559 = vadd.xlane.f32.xlu1 %v558_v20  ;;  %v1433_v22 = vpop.f32.mrf.mxu0 }
 0x480   :  { %1435 = vmatpush3.xpose.msk.msra.mxu1 %vm129_vm2, %v1433_v22  ;;  %1445 = vmatprep.subr.mxu0 %v1433_v22  ;;  %v555_v23 = vsel %vm129_vm2, %v551_v21, 0.0  ;;  %v554_v24 = vmul.f32 %v1433_v22, %v550_v16 }
 0x481   :  { %556 = vadd.xlane.f32.xlu0 %v555_v23  ;;  %v538_v25 = vpop.f32.mrf.mxu0  ;;  %1446 = vmatpush3.msra.mxu0 %v1433_v22 }
 0x482   :  { %1447 = vmatprep.subr.mxu0 %v538_v25  ;;  %1436 = vmatprep.subr.mxu1 %v1558_v6  ;;  %v564_v26 = vsel %vm129_vm2, %v554_v24, 0.0  ;;  %v553_v27 = vmul.f32 %v550_v16, %v538_v25 }
 0x483   :  { %565 = vadd.xlane.f32.xlu1 %v564_v26  ;;  %1448 = vmatpush3.msra.mxu0 %v538_v25 }
 0x484   :  { %1437 = vmatpush3.xpose.msk.msra.mxu1 %vm129_vm2, %v538_v25  ;;  %1449 = vmatprep.subr.mxu0 %v1430_v17  ;;  %v561_v28 = vsel %vm129_vm2, %v553_v27, 0.0 }
 0x485   :  { %1450 = vmatpush3.msra.mxu0 %v1430_v17  ;;  %562 = vadd.xlane.f32.xlu0 %v561_v28 }
 0x486   :  { %1451 = vmatprep.subr.mxu0 %v528_v19  ;;  %1438 = vmatprep.subr.mxu1 %v1558_v6 }
 0x487   :  { %1452 = vmatpush3.msra.mxu0 %v528_v19 }
 0x488   :  { %1439 = vmatpush3.xpose.msk.msra.mxu1 %vm129_vm2, %v1430_v17  ;;  %1459 = vmatprep.subr.mxu0 %v1558_v6 }
 0x489   :  { %1440 = vmatprep.subr.mxu1 %v1558_v6 }
 0x48c   :  { %1441 = vmatpush3.xpose.msk.msra.mxu1 %vm129_vm2, %v528_v19 }
 0x48d   :  { %1466 = vmatprep.subr.mxu1 %v1558_v6 }
 0x48f   :  { %1443 = vmatmul.mubr.msk.f32.vlgmr.msra.gmra.mxu1 %vm129_vm2, %v568_v29 }
 0x490   :  { %1470 = vmatprep.mubr.msk.f32.mxu1 %vm1559_vm1, %v1558_v6 }
 0x508   :  { %v560_v30 = vpop.xlane.xlu1 %559 }
 0x50a   :  { %v557_v31 = vpop.xlane.xlu0 %556 }
 0x50c   :  { %v566_v35 = vpop.xlane.xlu1 %565 }
 0x50e   :  { %v563_v37 = vpop.xlane.xlu0 %562 }
 0x54f   :  { %v649_v33 = vpop.f32.mrf.mxu1 }
 0x550   :  { %v656_v36 = vrot.slane %v649_v33, %v1603_v9 }
 0x551   :  { %v1444_v40 = vpop.f32.mrf.mxu1 }
 0x552   :  { %v658_v41 = vadd.f32 %v656_v36, %v560_v30  ;;  %v657_v43 = vadd.f32 %v656_v36, %v557_v31  ;;  %v660_v44 = vadd.f32 %v656_v36, %v566_v35  ;;  %v659_v45 = vadd.f32 %v656_v36, %v563_v37 }
 0x553   :  { %v724_v36 = vrot.slane %v1705_v15, %v298_v42 }
 0x554   :  { %v662_v46 = vmul.f32 0.2, %v658_v41  ;;  %v661_v47 = vmul.f32 0.2, %v657_v43  ;;  %v664_v48 = vmul.f32 0.2, %v660_v44 }
 0x555   :  { %v663_v49 = vmul.f32 0.2, %v659_v45 }
 0x556   :  { %v666_v50 = vmax.f32 %v658_v41, %v662_v46  ;;  %v665_v51 = vmax.f32 %v657_v43, %v661_v47  ;;  %v668_v7 = vmax.f32 %v660_v44, %v664_v48  ;;  %v1561_v46 = vmov 0  }
 0x557   :  { %v667_v52 = vmax.f32 %v659_v45, %v663_v49  ;;  %1500 = vset.pattern.permute.xlu1 %v1561_v46  ;;  %1501 = vset.pattern.permute.xlu0 %v1561_v46 }
 0x558   :  { %v670_v53 = vsel %vm13_vm3, %v666_v50, -1e+09  ;;  %v669_v54 = vsel %vm12_vm4, %v665_v51, -1e+09  ;;  %v672_v10 = vsel %vm15_vm5, %v668_v7, -1e+09 }
 0x559   :  { %v676_v55 = vsel %vm129_vm2, %v670_v53, -inf  ;;  %v673_v56 = vsel %vm129_vm2, %v669_v54, -inf  ;;  %v671_v57 = vsel %vm14_vm6, %v667_v52, -1e+09  ;;  %v682_v58 = vsel %vm129_vm2, %v672_v10, -inf }
 0x55a   :  { %677 = vmax.xlane.f32.xlu1 %v676_v55  ;;  %674 = vmax.xlane.f32.xlu0 %v673_v56  ;;  %v679_v59 = vsel %vm129_vm2, %v671_v57, -inf  ;;  %v911_v51 = vld [vmem:[%s1823_s0 + $0x88] sm:$0x3] }
 0x55e   :  { %683 = vmax.xlane.f32.xlu1 %v682_v58  ;;  %680 = vmax.xlane.f32.xlu0 %v679_v59 }
 0x5e3   :  { %v678_v60 = vpop.xlane.xlu1 %677  ;;  %v675_v61 = vpop.xlane.xlu0 %674 }
 0x5e4   :  { %v686_v62 = vsub.f32 %v670_v53, %v678_v60  ;;  %v685_v63 = vsub.f32 %v669_v54, %v675_v61 }
 0x5e6   :  { %v691_v0 = vmul.f32 1.442695, %v686_v62  ;;  %v689_v1 = vmul.f32 1.442695, %v685_v63  ;;  %v1157_v62 = vld [vmem:[%s1823_s0 + $0xb0] sm:$0xff] }
 0x5e7   :  { %v684_v2 = vpop.xlane.xlu1 %683  ;;  %v681_v3 = vpop.xlane.xlu0 %680 }
 0x5e8   :  { %1526 = vpow2.f32 %v691_v0  ;;  %v688_v4 = vsub.f32 %v672_v10, %v684_v2  ;;  %v687_v5 = vsub.f32 %v671_v57, %v681_v3  ;;  %v1006_v10 = vld [vmem:[%s1823_s0 + $0x90] sm:$0x3] }
 0x5e9   :  { %1528 = vpow2.f32 %v689_v1 }
 0x5ea   :  { %v695_v11 = vmul.f32 1.442695, %v688_v4  ;;  %v693_v12 = vmul.f32 1.442695, %v687_v5  ;;  %v1082_v4 = vld [vmem:[%s1823_s0 + $0xa0] sm:$0xff]  ;;  %v1081_v5 = vld [vmem:[%s1823_s0 + $0x98] sm:$0xff] }
 0x5ec   :  { %1530 = vpow2.f32 %v695_v11  ;;  %v1156_v11 = vld [vmem:[%s1823_s0 + $0xa8] sm:$0xff] }
 0x5ed   :  { %1532 = vpow2.f32 %v693_v12 }
 0x5f5   :  { %v1527_v13 = vpop.eup %1526 }
 0x5f6   :  { %v1529_v14 = vpop.eup %1528  ;;  %v698_v16 = vsel %vm13_vm3, %v1527_v13, 0.0  ;;  %vm918_vm3 = vcmask 123904  }
 0x5f7   :  { %v704_v17 = vsel %vm129_vm2, %v698_v16, 0.0  ;;  %v697_v18 = vsel %vm12_vm4, %v1529_v14, 0.0  ;;  %v1329_v14 = vld [vmem:[%s1823_s0 + $0xb8] ss:$0 sm:$0xff]  ;;  %vm1266_vm4 = vcmask 58400   ;;  %s1563_s0 = smov 124  }
 0x5f8   :  { %705 = vadd.xlane.f32.xlu1 %v704_v17  ;;  %v701_v19 = vsel %vm129_vm2, %v697_v18, 0.0 }
 0x5f9   :  { %v1531_v20 = vpop.eup %1530  ;;  %702 = vadd.xlane.f32.xlu0 %v701_v19 }
 0x5fa   :  { %v1533_v21 = vpop.eup %1532  ;;  %v700_v22 = vsel %vm15_vm5, %v1531_v20, 0.0 }
 0x5fb   :  { %v710_v23 = vsel %vm129_vm2, %v700_v22, 0.0  ;;  %v699_v32 = vsel %vm14_vm6, %v1533_v21, 0.0 }
 0x5fc   :  { %711 = vadd.xlane.f32.xlu1 %v710_v23  ;;  %v707_v24 = vsel %vm129_vm2, %v699_v32, 0.0 }
 0x5fd   :  { %708 = vadd.xlane.f32.xlu0 %v707_v24 }
 0x681   :  { %v706_v34 = vpop.xlane.xlu1 %705 }
 0x682   :  { %1534 = vrcp.f32 %v706_v34  ;;  %v703_v25 = vpop.xlane.xlu0 %702 }
 0x683   :  { %1536 = vrcp.f32 %v703_v25 }
 0x685   :  { %v712_v26 = vpop.xlane.xlu1 %711 }
 0x686   :  { %1538 = vrcp.f32 %v712_v26  ;;  %v709_v27 = vpop.xlane.xlu0 %708 }
 0x687   :  { %1540 = vrcp.f32 %v709_v27 }
 0x68f   :  { %v1535_v28 = vpop.eup %1534 }
 0x690   :  { %v1537_v38 = vpop.eup %1536  ;;  %v718_v29 = vmul.f32 %v1535_v28, %v698_v16 }
 0x691   :  { %v717_v30 = vmul.f32 %v1537_v38, %v697_v18 }
 0x693   :  { %v1539_v31 = vpop.eup %1538  ;;  %1453 = vmatprep.mubr.msk.f32.mxu0 %vm129_vm2, %v717_v30 }
 0x694   :  { %v1541_v39 = vpop.eup %1540  ;;  %1454 = vmatmul.mubr.msk.f32.vlgmr.msra.gmra.mxu0 %vm129_vm2, %v718_v29  ;;  %v720_v33 = vmul.f32 %v1539_v31, %v700_v22 }
 0x695   :  { %v719_v35 = vmul.f32 %v1541_v39, %v699_v32 }
 0x697   :  { %1456 = vmatprep.mubr.msk.f32.mxu0 %vm129_vm2, %v719_v35 }
 0x698   :  { %1457 = vmatmul.mubr.msk.f32.gmra.mxu0 %vm129_vm2, %v720_v33  ;;  %vm912_vm2 = vcmp.gt.f32.partialorder %v911_v51, 0.5 }
 0x699   :  { %1463 = vmatprep.mubr.msk.f32.mxu0 %vm1559_vm1, %v1558_v6 }
 0x754   :  { %v1455_v37 = vpop.f32.mrf.mxu0 }
 0x755   :  { %v809_v40 = vadd.f32 %v1455_v37, %v724_v36 }
 0x756   :  { %v803_v41 = vpop.f32.mrf.mxu0 }
 0x757   :  { %v804_v43 = vadd.f32 %v803_v41, %v724_v36 }
 0x758   :  { %v1458_v44 = vpop.f32.mrf.mxu0 }
 0x759   :  { %v819_v45 = vadd.f32 %v1458_v44, %v724_v36 }
 0x75a   :  { %v813_v47 = vpop.f32.mrf.mxu0 }
 0x75b   :  { %v814_v48 = vadd.f32 %v813_v47, %v724_v36  ;;  %831 = vrot.lane.b32.xlu0 %v819_v45, %s1562_s9 }
 0x75d   :  { %829 = vrot.lane.b32.xlu1 %v814_v48, %s1562_s9 }
 0x761   :  { %825 = vperm.xlu1 %1500, %v822_v8  }
 0x7cd   :  { %v832_v42 = vpop.permute.xlu0 %831 }
 0x7ce   :  { %1460 = vmatpush3.xpose.msk.msra.mxu0 %vm23_vm0, %v832_v42  ;;  %1467 = vmatpush3.msra.mxu1 %v832_v42 }
 0x7cf   :  { %1468 = vmatprep.subr.mxu1 %v1558_v6  ;;  %v830_v15 = vpop.permute.xlu1 %829  ;;  %1461 = vmatprep.subr.mxu0 %v1558_v6 }
 0x7d0   :  { %1469 = vmatpush3.msra.mxu1 %v830_v15 }
 0x7d1   :  { %1480 = vmatprep.subr.mxu1 %v1558_v6 }
 0x7d2   :  { %1462 = vmatpush3.xpose.msk.msra.mxu0 %vm23_vm0, %v830_v15 }
 0x7d3   :  { %1473 = vmatprep.subr.mxu0 %v1558_v6 }
 0x7d5   :  { %1464 = vmatmul.mubr.msk.f32.vlgmr.msra.gmra.mxu0 %vm23_vm0, %v822_v8 }
 0x7d6   :  { %1474 = vmatpush3.msra.mxu0 %v809_v40  ;;  %1477 = vmatprep.mubr.msk.f32.mxu0 %vm1559_vm1, %v1558_v6 }
 0x7d7   :  { %1475 = vmatprep.subr.mxu0 %v1558_v6 }
 0x7d8   :  { %1476 = vmatpush3.msra.mxu0 %v804_v43 }
 0x7d9   :  { %1487 = vmatprep.subr.mxu0 %v1558_v6  ;;  %1478 = vmatmul.mubr.msk.f32.vlgmr.msra.gmra.mxu0 %vm23_vm0, %v1006_v10 }
 0x7da   :  { %1491 = vmatprep.mubr.msk.f32.mxu0 %vm1559_vm1, %v1558_v6  ;;  %1488 = vmatpush3.msra.mxu0 %v1157_v62 }
 0x7db   :  { %1489 = vmatprep.subr.mxu0 %v1558_v6 }
 0x7dc   :  { %v826_v49 = vpop.permute.xlu1 %825  ;;  %1490 = vmatpush3.msra.mxu0 %v1156_v11 }
 0x7dd   :  { %v833_v50 = vrot.slane %v826_v49, 1 }
 0x895   :  { %v907_v7 = vpop.f32.mrf.mxu0 }
 0x896   :  { %v908_v52 = vadd.f32 %v907_v7, %v833_v50 }
 0x897   :  { %v1465_v53 = vpop.f32.mrf.mxu0 }
 0x898   :  { %v916_v54 = vrot.slane %v908_v52, %v1603_v9 }
 0x899   :  { %v1076_v63 = vpop.f32.mrf.mxu0 }
 0x89a   :  { %v917_v55 = vsel %vm912_vm2, %v916_v54, -1e+09 }
 0x89b   :  { %v919_v56 = vsel %vm918_vm3, %v917_v55, -inf  ;;  %v1479_v0 = vpop.f32.mrf.mxu0 }
 0x89c   :  { %920 = vmax.xlane.f32.xlu1 %v919_v56 }
 0x925   :  { %v921_v57 = vpop.xlane.xlu1 %920 }
 0x926   :  { %v922_v58 = vsub.f32 %v917_v55, %v921_v57 }
 0x928   :  { %v923_v59 = vmul.f32 1.442695, %v922_v58 }
 0x92a   :  { %1542 = vpow2.f32 %v923_v59 }
 0x937   :  { %v1543_v60 = vpop.eup %1542 }
 0x938   :  { %v925_v61 = vsel %vm912_vm2, %v1543_v60, 0.0 }
 0x939   :  { %v926_v9 = vsel %vm918_vm3, %v925_v61, 0.0 }
 0x93a   :  { %927 = vadd.xlane.f32.xlu0 %v926_v9 }
 0x9c3   :  { %v928_v1 = vpop.xlane.xlu0 %927 }
 0x9c4   :  { %1544 = vrcp.f32 %v928_v1 }
 0x9d1   :  { %v1545_v2 = vpop.eup %1544 }
 0x9d2   :  { %v930_v3 = vmul.f32 %v1545_v2, %v925_v61 }
 0x9d4   :  { %1471 = vmatmul.mubr.msk.f32.vlgmr.msra.gmra.mxu1 %vm23_vm0, %v930_v3 }
 0x9d5   :  { %1481 = vmatpush3.msra.mxu1 %v1082_v4  ;;  %1484 = vmatprep.mubr.msk.f32.mxu1 %vm1559_vm1, %v1558_v6  ;;  %vm1236_vm1 = vcmask 25600  }
 0x9d6   :  { %1482 = vmatprep.subr.mxu1 %v1558_v6 }
 0x9d7   :  { %1483 = vmatpush3.msra.mxu1 %v1081_v5 }
 0x9d8   :  { %1485 = vmatmul.mubr.msk.f32.vlgmr.msra.gmra.mxu1 %vm23_vm0, %v1076_v63 }
 0xa94   :  { %v1002_v12 = vpop.f32.mrf.mxu1 }
 0xa95   :  { %1492 = vmatmul.mubr.msk.f32.vlgmr.msra.gmra.mxu0 %vm23_vm0, %v1002_v12 }
 0xa96   :  { %v1472_v13 = vpop.f32.mrf.mxu1 }
 0xa98   :  { %v1152_v16 = vpop.f32.mrf.mxu1 }
 0xa99   :  { %v1235_v17 = vadd.f32 %v1329_v14, %v1152_v16 }
 0xa9a   :  { %v1486_v6 = vpop.f32.mrf.mxu1 }
 0xa9b   :  { %v1237_v18 = vsel %vm1236_vm1, %v1235_v17, -inf }
 0xa9c   :  { %1238 = vmax.xlane.f32.xlu1 %v1237_v18 }
 0xb25   :  { %v1239_v28 = vpop.xlane.xlu1 %1238 }
 0xb26   :  { %v1240_v38 = vsub.f32 %v1235_v17, %v1239_v28 }
 0xb28   :  { %v1241_v30 = vmul.f32 1.442695, %v1240_v38 }
 0xb55   :  { %v1227_v19 = vpop.f32.mrf.mxu0 }
 0xb56   :  { %v1250_v20 = vadd.f32 %v1329_v14, %v1227_v19  ;;  %v1264_v21 = vadd.f32 %v1227_v19, %v1152_v16 }
 0xb57   :  { %v1493_v22 = vpop.f32.mrf.mxu0 }
 0xb58   :  { %v1251_v23 = vsel %vm1236_vm1, %v1250_v20, -inf  ;;  %v1265_v32 = vadd.f32 %v1329_v14, %v1264_v21 }
 0xb59   :  { %1252 = vmax.xlane.f32.xlu1 %v1251_v23 }
 0xb5a   :  { %v1267_v24 = vsel %vm1266_vm4, %v1265_v32, -inf }
 0xb5b   :  { %1268 = vmax.xlane.f32.xlu0 %v1267_v24 }
 0xbe2   :  { %v1253_v29 = vpop.xlane.xlu1 %1252 }
 0xbe3   :  { %v1254_v31 = vsub.f32 %v1250_v20, %v1253_v29 }
 0xbe4   :  { %v1269_v34 = vpop.xlane.xlu0 %1268 }
 0xbe5   :  { %v1270_v25 = vsub.f32 %v1265_v32, %v1269_v34  ;;  %v1255_v39 = vmul.f32 1.442695, %v1254_v31 }
 0xbe7   :  { %v1271_v26 = vmul.f32 1.442695, %v1270_v25 }
 0xbe9   :  { %1546 = vpow2.f32 %v1271_v26 }
 0xbea   :  { %1548 = vpow2.f32 %v1241_v30 }
 0xbeb   :  { %1550 = vpow2.f32 %v1255_v39 }
 0xbf6   :  { %v1547_v27 = vpop.eup %1546 }
 0xbf7   :  { %1274 = vrot.lane.b32.xlu0 %v1547_v27, %s1563_s0  ;;  %v1549_v36 = vpop.eup %1548 }
 0xbf8   :  { %v1243_v37 = vsel %vm1236_vm1, %v1549_v36, 0.0  ;;  %v1551_v40 = vpop.eup %1550 }
 0xbf9   :  { %v1257_v41 = vsel %vm1236_vm1, %v1551_v40, 0.0 }
 0xc69   :  { %v1275_v33 = vpop.permute.xlu0 %1274 }
 0xc6a   :  { %v1277_v35 = vsel %vm1236_vm1, %v1275_v33, 0.0 }
 0xc6b   :  { %1278 = vadd.xlane.f32.xlu1 %v1277_v35 }
 0xc6f   :  { %1244 = vadd.xlane.f32.xlu1 %v1243_v37 }
 0xc73   :  { %1258 = vadd.xlane.f32.xlu1 %v1257_v41 }
 0xcf4   :  { %v1279_v43 = vpop.xlane.xlu1 %1278 }
 0xcf5   :  { %1552 = vlog2.f32 %v1279_v43 }
 0xcf8   :  { %v1245_v44 = vpop.xlane.xlu1 %1244 }
 0xcf9   :  { %1554 = vlog2.f32 %v1245_v44 }
 0xcfc   :  { %v1259_v45 = vpop.xlane.xlu1 %1258 }
 0xcfd   :  { %1556 = vlog2.f32 %v1259_v45 }
 0xd02   :  { %v1553_v46 = vpop.eup %1552 }
 0xd03   :  { %v1281_v47 = vmul.f32 0.6931472, %v1553_v46 }
 0xd05   :  { %v1282_v48 = vsub.f32 %v1270_v25, %v1281_v47 }
 0xd06   :  { %v1555_v8 = vpop.eup %1554 }
 0xd07   :  { %v1247_v42 = vmul.f32 0.6931472, %v1555_v8  ;;  %1284 = vrot.lane.b32.xlu1 %v1282_v48, %s1563_s0 }
 0xd09   :  { %v1248_v15 = vsub.f32 %v1240_v38, %v1247_v42 }
 0xd0a   :  { %v1557_v49 = vpop.eup %1556 }
 0xd0b   :  { %v1261_v50 = vmul.f32 0.6931472, %v1557_v49  ;;  %1249 = vst.msk [vmem:[%s1824_s1] sm:$0x3] %vm1236_vm1, %v1248_v15 }
 0xd0d   :  { %v1262_v51 = vsub.f32 %v1254_v31, %v1261_v50 }
 0xd0f   :  { %1263 = vst.msk [vmem:[%s1824_s1 + $0x2] sm:$0x3] %vm1236_vm1, %v1262_v51 }
 0xd79   :  { %v1285_v7 = vpop.permute.xlu1 %1284 }
 0xd7a   :  { %1287 = vst.msk [vmem:[%s1824_s1 + $0x4] sm:$0x3] %vm1236_vm1, %v1285_v7 }

</bundles_post_ra>
